<compile_context>
chip_gen: v7x
topology: tpu7x:2x2x1
jax: 0.10.0
libtpu: 0.0.40
codegen_flags: <defaults>
</compile_context>

<pallas_src>
import jax
import jax.numpy as jnp
from jax.experimental import pallas as pl
from jax.experimental.pallas import tpu as pltpu


# Per-tile VMEM budget.  The auto-pipeline holds ~4 tiles resident
# (double-buffered input + output), so 4 * 6 MiB = 24 MiB stays inside the
# 32 MiB scoped limit we request below (safe on v5e/v6e/v7x).
_MAX_TILE_BYTES = 6 * 1024 * 1024
_VMEM_LIMIT_BYTES = 32 * 1024 * 1024

# Lane-dense column widths to try (largest first); all multiples of 128.
_LANE_WIDTHS = (4096, 2048, 1024, 512, 256, 128)


def _identity_kernel(x_ref, o_ref):
    # Full-tile copy: the entire forward-pass semantics of LLM4REC.
    o_ref[...] = x_ref[...]


def _choose_block_rows(rows, cols, itemsize):
    """Pick the row-tile: as large as the VMEM budget allows, multiple of 32
    (legal sublane tiling for f32/bf16/int8) unless it spans the full rows."""
    total_bytes = rows * cols * itemsize
    if total_bytes <= _MAX_TILE_BYTES:
        # Whole array fits in one tile.  Still split into >=2 grid steps when
        # the row count allows it, so both v7x TensorCores get work.
        if rows >= 64:
            half = (rows + 1) // 2
            return min(rows, ((half + 31) // 32) * 32)
        return rows
    bytes_per_row = max(1, cols * itemsize)
    rows_fit = max(32, (_MAX_TILE_BYTES // bytes_per_row) // 32 * 32)
    return min(rows, rows_fit)


@jax.jit
def _identity_forward(x):
    orig_shape = x.shape
    n = x.size

    # Degenerate cases: nothing to copy / nothing worth launching a grid for.
    if n == 0 or x.ndim == 0:
        return x

    # Lane-dense retiling of the flat element stream when the size allows it;
    # otherwise keep the original last dim (full-dim blocks are always legal).
    if n % 128 == 0:
        cols = next(c for c in _LANE_WIDTHS if n % c == 0)
    else:
        cols = orig_shape[-1]
    rows = n // cols

    flat = x.reshape(rows, cols)
    itemsize = jnp.dtype(x.dtype).itemsize
    block_rows = _choose_block_rows(rows, cols, itemsize)
    grid = (pl.cdiv(rows, block_rows),)

    out_flat = pl.pallas_call(
        _identity_kernel,
        out_shape=jax.ShapeDtypeStruct((rows, cols), x.dtype),
        grid=grid,
        in_specs=[pl.BlockSpec((block_rows, cols), lambda i: (i, 0))],
        out_specs=pl.BlockSpec((block_rows, cols), lambda i: (i, 0)),
        # Identity copy: let XLA alias input and output HBM buffers and elide
        # the traffic entirely where possible.  Bit-exact either way.
        input_output_aliases={0: 0},
        compiler_params=pltpu.CompilerParams(
            dimension_semantics=("parallel",),
            vmem_limit_bytes=_VMEM_LIMIT_BYTES,
        ),
    )(flat)

    return out_flat.reshape(orig_shape)


class LLM4RECPallas:
    """Pallas equivalent of the (parameter-free) LLM4REC module."""

    def __init__(self, input_size, hidden_size, num_layers):
        # Matches the PyTorch __init__: no parameters are created.
        self.input_size = input_size
        self.hidden_size = hidden_size
        self.num_layers = num_layers
        # TODO(synk): the reference module defines no weights or layers; the
        # forward is the identity, so there is nothing else to port.

    def __call__(self, x):
        return self.forward(x)

    def forward(self, x):
        return _identity_forward(x)


if __name__ == "__main__":
    # Small shapes consistent with an LLM-for-recommendation style input:
    # batch=2, seq=8, hidden=32.
    input_size, hidden_size, num_layers = 32, 32, 2
    model = LLM4RECPallas(input_size, hidden_size, num_layers)

    key = jax.random.PRNGKey(0)
    x = jax.random.normal(key, (2, 8, 32), dtype=jnp.float32)

    y = model(x)
    y = jax.block_until_ready(y)

    assert y.shape == x.shape, (y.shape, x.shape)
    assert y.dtype == x.dtype, (y.dtype, x.dtype)
    assert bool(jnp.all(y == x)), "identity forward mismatch"

    print("KERNEL_OK")
</pallas_src>

<mosaic_0001>
module attributes {stable_mosaic.version = 11 : i64} {
  func.func @_identity_kernel(%arg0: i32, %arg1: memref<1x512xf32, #tpu.memory_space<vmem>>, %arg2: memref<1x512xf32, #tpu.memory_space<vmem>>) attributes {dimension_semantics = [#tpu.dimension_semantics<parallel>], iteration_bounds = array<i64: 1>, scalar_prefetch = 0 : i64, scratch_operands = 0 : i64, tpu.core_type = #tpu.core_type<tc>, window_params = [{transform_indices = @transform_0, window_bounds = array<i64: 1, 512>}, {transform_indices = @transform_1, window_bounds = array<i64: 1, 512>}]} {
    %c0 = arith.constant 0 : index
    %c0_0 = arith.constant 0 : index
    %0 = vector.load %arg1[%c0, %c0_0] : memref<1x512xf32, #tpu.memory_space<vmem>>, vector<1x512xf32>
    %c0_1 = arith.constant 0 : index
    %c0_2 = arith.constant 0 : index
    %1 = vector.load %arg2[%c0_1, %c0_2] : memref<1x512xf32, #tpu.memory_space<vmem>>, vector<1x512xf32>
    tpu.vector_store %arg2[%c0_1, %c0_2], %0 {strides = array<i32>} : memref<1x512xf32, #tpu.memory_space<vmem>>, vector<1x512xf32>,
    return
  }
  func.func @transform_0(%arg0: i32) -> (i32, i32) {
    %c0_i32 = arith.constant 0 : i32
    %c0_i32_0 = arith.constant 0 : i32
    return %arg0, %c0_i32 : i32, i32
  }
  func.func @transform_1(%arg0: i32) -> (i32, i32) {
    %c0_i32 = arith.constant 0 : i32
    %c0_i32_0 = arith.constant 0 : i32
    return %arg0, %c0_i32 : i32, i32
  }
}

</mosaic_0001>

<bundles_post_ra>
// kernel: _identity_forward.1
= control target key start
LH: loop header
LB: loop body
LE: loop exit
PB: predicated region body
PF: predicated region fallthrough
CT: control target
= control target key end

     0   :  { %v9_v0 = vlaneseq  ;;  %s34_s0 = inlined_call_operand.vmem [shape: f32[1,512], index: 0, kind: input, shape index: {}, may-alias: {0,1}]   ;;  %s35_s1 = inlined_call_operand.vmem [shape: f32[1,512], index: 1, kind: output, shape index: {}, may-alias: {0,1}]  }
   0x1   :  { %v8_v1 = vld [vmem:[%s34_s0] sm:$0xf] }
   0x2   :  { %vm11_vm0 = vcmp.lt.s32.totalorder %v9_v0, 512 }
   0x3   :  { %13 = vst.msk [vmem:[%s35_s1] sm:$0xf] %vm11_vm0, %v8_v1 }

</bundles_post_ra>
